<compile_context>
chip_gen: v6e
topology: v6e:2x2x1
jax: 0.10.0
libtpu: 0.0.40
codegen_flags: <defaults>
</compile_context>

<pallas_src>
import functools

import jax
import jax.numpy as jnp
from jax.experimental import pallas as pl
from jax.experimental.pallas import tpu as pltpu

F32 = jnp.float32
MXU_DTYPE = jnp.bfloat16          # MXU operand dtype (f32 accumulation)
BN_EPS = 1e-5
VMEM_LIMIT_BYTES = 32 * 1024 * 1024


def _compiler_params(sem):
    return pltpu.CompilerParams(dimension_semantics=sem,
                                vmem_limit_bytes=VMEM_LIMIT_BYTES)


# ----------------------------------------------------------------------------
# Pallas kernels
# ----------------------------------------------------------------------------
def _mm_bias_kernel(x_ref, w_ref, shift_ref, o_ref):
    """o = x @ w + shift (bf16 operands, f32 accumulate/epilogue)."""
    y = jnp.dot(x_ref[...], w_ref[...], preferred_element_type=jnp.float32)
    o_ref[...] = (y + shift_ref[...]).astype(o_ref.dtype)


def _attention_psi_kernel(g1_ref, x2_ref, wx_ref, sx_ref, wpsi_ref, sp_ref,
                          o_ref):
    """psi = sigmoid( (relu(g1 + x2@Wx + bx) . wpsi) + bp ).

    g1 already has ConvTranspose + W_g + BN_g folded in.  The psi projection
    (Ci -> 1) is a VPU multiply + lane reduction instead of an N=1 matmul.
    """
    x1b = jnp.dot(x2_ref[...], wx_ref[...],
                  preferred_element_type=jnp.float32) + sx_ref[...]
    a = jnp.maximum(g1_ref[...].astype(jnp.float32) + x1b, 0.0)
    p = jnp.sum(a * wpsi_ref[...], axis=-1, keepdims=True) + sp_ref[...]
    o_ref[...] = jax.nn.sigmoid(p).astype(o_ref.dtype)


def _conv3x3_kernel(x_ref, wk_ref, shift_ref, o_ref, *, th, wd):
    """3x3 conv + folded BN + ReLU; 9-tap accumulation from a padded block.

    x_ref:  (1, H+2, W+2, Cin)  full padded plane for this batch element
    wk_ref: (9, Cin, Cout)      per-tap weights (BN scale folded), (kh,kw) major
    o_ref:  (1, th, W, Cout)    one row-tile of the output
    """
    row0 = pl.multiple_of(pl.program_id(1) * th, th)
    cout = o_ref.shape[-1]
    acc = jnp.zeros((th * wd, cout), jnp.float32)
    for k in range(9):
        kh, kw = divmod(k, 3)
        tap = x_ref[0, pl.ds(row0 + kh, th), pl.ds(kw, wd), :]
        tap = tap.reshape(th * wd, tap.shape[-1]).astype(MXU_DTYPE)
        acc = acc + jnp.dot(tap, wk_ref[k], preferred_element_type=jnp.float32)
    y = jnp.maximum(acc + shift_ref[...], 0.0)
    o_ref[0] = y.reshape(th, wd, cout).astype(o_ref.dtype)


def _conv3x3_concat_gate_kernel(x2_ref, psi_ref, wa_ref, wb_ref, shift_ref,
                                o_ref, *, th, wd):
    """First DoubleConv conv with the channel concat fused in.

    Implements  relu(BN(Conv3x3(concat([x2, x2*psi], C))))  without ever
    materializing x2*psi or the concatenated tensor: per tap, the weight is
    split into the x2 half (wa) and the gated half (wb).
    """
    row0 = pl.multiple_of(pl.program_id(1) * th, th)
    cout = o_ref.shape[-1]
    acc = jnp.zeros((th * wd, cout), jnp.float32)
    for k in range(9):
        kh, kw = divmod(k, 3)
        x2_tap = x2_ref[0, pl.ds(row0 + kh, th), pl.ds(kw, wd), :]
        psi_tap = psi_ref[0, pl.ds(row0 + kh, th), pl.ds(kw, wd), :]
        x2_m = x2_tap.reshape(th * wd, x2_tap.shape[-1])
        psi_m = psi_tap.reshape(th * wd, 1)
        acc = acc + jnp.dot(x2_m.astype(MXU_DTYPE), wa_ref[k],
                            preferred_element_type=jnp.float32)
        acc = acc + jnp.dot((x2_m * psi_m).astype(MXU_DTYPE), wb_ref[k],
                            preferred_element_type=jnp.float32)
    y = jnp.maximum(acc + shift_ref[...], 0.0)
    o_ref[0] = y.reshape(th, wd, cout).astype(o_ref.dtype)


# ----------------------------------------------------------------------------
# Pallas wrappers
# ----------------------------------------------------------------------------
def _pad_rows(x, tm):
    m = x.shape[0]
    mp = pl.cdiv(m, tm) * tm
    if mp != m:
        x = jnp.pad(x, ((0, mp - m), (0, 0)))
    return x, mp


def matmul_bias(x, w, shift, out_dtype=F32, tm=128):
    """(M,K) @ (K,N) + shift, tiled over M.  Operands in bf16, f32 accumulate.

    For production sizes sweep tm to 512-1024 (raise VMEM_LIMIT_BYTES) and add
    K/N grid axes on v7x (64 MiB VMEM).
    """
    m, k = x.shape
    n_out = w.shape[1]
    xp, mp = _pad_rows(x.astype(MXU_DTYPE), tm)
    out = pl.pallas_call(
        _mm_bias_kernel,
        out_shape=jax.ShapeDtypeStruct((mp, n_out), out_dtype),
        grid=(mp // tm,),
        in_specs=[
            pl.BlockSpec((tm, k), lambda i: (i, 0)),
            pl.BlockSpec((k, n_out), lambda i: (0, 0)),
            pl.BlockSpec((1, n_out), lambda i: (0, 0)),
        ],
        out_specs=pl.BlockSpec((tm, n_out), lambda i: (i, 0)),
        compiler_params=_compiler_params(("parallel",)),
    )(xp, w.astype(MXU_DTYPE), shift.reshape(1, n_out).astype(F32))
    return out[:m]


def attention_psi(g1_flat, x2_flat, wx, shift_x, wpsi_row, shift_p, tm=128):
    """Fused attention gate on flattened pixels -> psi (1 channel)."""
    m, ch = x2_flat.shape
    ci = wx.shape[1]
    g1p, mp = _pad_rows(g1_flat.astype(MXU_DTYPE), tm)
    x2p, _ = _pad_rows(x2_flat.astype(MXU_DTYPE), tm)
    out = pl.pallas_call(
        _attention_psi_kernel,
        out_shape=jax.ShapeDtypeStruct((mp, 1), F32),
        grid=(mp // tm,),
        in_specs=[
            pl.BlockSpec((tm, ci), lambda i: (i, 0)),
            pl.BlockSpec((tm, ch), lambda i: (i, 0)),
            pl.BlockSpec((ch, ci), lambda i: (0, 0)),
            pl.BlockSpec((1, ci), lambda i: (0, 0)),
            pl.BlockSpec((1, ci), lambda i: (0, 0)),
            pl.BlockSpec((1, 1), lambda i: (0, 0)),
        ],
        out_specs=pl.BlockSpec((tm, 1), lambda i: (i, 0)),
        compiler_params=_compiler_params(("parallel",)),
    )(g1p, x2p, wx.astype(MXU_DTYPE),
      shift_x.reshape(1, ci).astype(F32),
      wpsi_row.reshape(1, ci).astype(F32),
      shift_p.reshape(1, 1).astype(F32))
    return out[:m]


def conv3x3_bn_relu(x_nhwc, wk, shift, th=8):
    """3x3 conv (pad=1) + folded BN + ReLU, taps accumulated in-kernel."""
    n, h, wd, cin = x_nhwc.shape
    cout = wk.shape[-1]
    if h % th != 0:
        th = h
    # TODO(synk): for large spatial sizes the full padded plane may not fit
    # VMEM; switch the input to a manually DMA'd halo'd row-tile (P4 pattern).
    xp = jnp.pad(x_nhwc.astype(F32), ((0, 0), (1, 1), (1, 1), (0, 0)))
    kern = functools.partial(_conv3x3_kernel, th=th, wd=wd)
    return pl.pallas_call(
        kern,
        out_shape=jax.ShapeDtypeStruct((n, h, wd, cout), F32),
        grid=(n, h // th),
        in_specs=[
            pl.BlockSpec((1, h + 2, wd + 2, cin), lambda b, i: (b, 0, 0, 0)),
            pl.BlockSpec((9, cin, cout), lambda b, i: (0, 0, 0)),
            pl.BlockSpec((1, cout), lambda b, i: (0, 0)),
        ],
        out_specs=pl.BlockSpec((1, th, wd, cout), lambda b, i: (b, i, 0, 0)),
        compiler_params=_compiler_params(("parallel", "parallel")),
    )(xp, wk, shift.reshape(1, cout).astype(F32))


def conv3x3_concat_gate_bn_relu(x2_nhwc, psi_nhwc, wk_a, wk_b, shift, th=8):
    """relu(BN(Conv3x3(concat([x2, x2*psi])))) with concat + gating fused."""
    n, h, wd, ch = x2_nhwc.shape
    cout = wk_a.shape[-1]
    if h % th != 0:
        th = h
    x2p = jnp.pad(x2_nhwc.astype(F32), ((0, 0), (1, 1), (1, 1), (0, 0)))
    psip = jnp.pad(psi_nhwc.astype(F32), ((0, 0), (1, 1), (1, 1), (0, 0)))
    kern = functools.partial(_conv3x3_concat_gate_kernel, th=th, wd=wd)
    return pl.pallas_call(
        kern,
        out_shape=jax.ShapeDtypeStruct((n, h, wd, cout), F32),
        grid=(n, h // th),
        in_specs=[
            pl.BlockSpec((1, h + 2, wd + 2, ch), lambda b, i: (b, 0, 0, 0)),
            pl.BlockSpec((1, h + 2, wd + 2, 1), lambda b, i: (b, 0, 0, 0)),
            pl.BlockSpec((9, ch, cout), lambda b, i: (0, 0, 0)),
            pl.BlockSpec((9, ch, cout), lambda b, i: (0, 0, 0)),
            pl.BlockSpec((1, cout), lambda b, i: (0, 0)),
        ],
        out_specs=pl.BlockSpec((1, th, wd, cout), lambda b, i: (b, i, 0, 0)),
        compiler_params=_compiler_params(("parallel", "parallel")),
    )(x2p, psip, wk_a, wk_b, shift.reshape(1, cout).astype(F32))


# ----------------------------------------------------------------------------
# Parameter initialization (deterministic, synthetic) and BN folding
# ----------------------------------------------------------------------------
def _bn_params(key, c):
    k1, k2, k3, k4 = jax.random.split(key, 4)
    gamma = 1.0 + 0.1 * jax.random.normal(k1, (c,), F32)
    beta = 0.1 * jax.random.normal(k2, (c,), F32)
    mean = 0.1 * jax.random.normal(k3, (c,), F32)
    var = jax.random.uniform(k4, (c,), F32, 0.5, 1.5)
    return gamma, beta, mean, var


def init_up_params(key, in_channels, out_channels):
    c = in_channels
    ch = c // 2
    ci = c // 4
    keys = jax.random.split(key, 16)
    p = {}
    # ConvTranspose2d(c, c//2, 2, stride=2): weight [c, c//2, 2, 2]
    p["up_w"] = 0.1 * jax.random.normal(keys[0], (c, ch, 2, 2), F32)
    p["up_b"] = 0.1 * jax.random.normal(keys[1], (ch,), F32)
    # AttentionBlock(ch, ch, ci): 1x1 convs stored as [Cin, Cout] matrices
    p["wg"] = 0.2 * jax.random.normal(keys[2], (ch, ci), F32)
    p["wg_b"] = 0.1 * jax.random.normal(keys[3], (ci,), F32)
    p["bn_g"] = _bn_params(keys[4], ci)
    p["wx"] = 0.2 * jax.random.normal(keys[5], (ch, ci), F32)
    p["wx_b"] = 0.1 * jax.random.normal(keys[6], (ci,), F32)
    p["bn_x"] = _bn_params(keys[7], ci)
    p["wpsi"] = 0.2 * jax.random.normal(keys[8], (ci, 1), F32)
    p["wpsi_b"] = 0.1 * jax.random.normal(keys[9], (1,), F32)
    p["bn_psi"] = _bn_params(keys[10], 1)
    # DoubleConv(in_channels, out_channels)
    p["c1_w"] = 0.1 * jax.random.normal(keys[11], (out_channels, c, 3, 3), F32)
    p["c1_b"] = 0.1 * jax.random.normal(keys[12], (out_channels,), F32)
    p["bn_c1"] = _bn_params(keys[13], out_channels)
    p["c2_w"] = 0.1 * jax.random.normal(keys[14],
                                        (out_channels, out_channels, 3, 3), F32)
    p["c2_b"] = 0.05 * jax.random.normal(keys[15], (out_channels,), F32)
    p["bn_c2"] = _bn_params(jax.random.fold_in(key, 99), out_channels)
    return p


def _fold_bn(conv_bias, bn):
    gamma, beta, mean, var = bn
    s = gamma / jnp.sqrt(var + BN_EPS)
    shift = (conv_bias - mean) * s + beta
    return s, shift


def _stack_conv_weight(w_oihw, scale):
    """(Cout, Cin, 3, 3) -> (9, Cin, Cout) with BN scale folded, (kh,kw) major."""
    cout, cin = w_oihw.shape[0], w_oihw.shape[1]
    wt = jnp.transpose(w_oihw, (2, 3, 1, 0)).reshape(9, cin, cout)
    return (wt * scale[None, None, :]).astype(MXU_DTYPE)


# ----------------------------------------------------------------------------
# Up.forward
# ----------------------------------------------------------------------------
def up_forward(x1_nchw, x2_nchw, p):
    # NCHW (PyTorch) -> NHWC (kernel layout)
    x1 = jnp.transpose(x1_nchw, (0, 2, 3, 1)).astype(F32)   # (N, H1, W1, Cin)
    x2 = jnp.transpose(x2_nchw, (0, 2, 3, 1)).astype(F32)   # (N, H2, W2, Ch)
    n, h1, w1, cin = x1.shape
    _, h2, w2, ch = x2.shape
    ci = p["wg"].shape[1]

    # --- ConvTranspose2d(2x2,s2) folded into the attention g-branch ---------
    # g1(2i+kh, 2j+kw) = x1(i,j) @ (Wup[:,:,kh,kw] @ Wg*sg) + const
    # => x1u is never materialized in HBM.
    sg, shift_g = _fold_bn(p["wg_b"], p["bn_g"])
    wg_s = p["wg"] * sg[None, :]                               # (Ch, Ci)
    w_fold = jnp.concatenate(
        [p["up_w"][:, :, kh, kw] @ wg_s for kh in range(2) for kw in range(2)],
        axis=1)                                                # (Cin, 4*Ci)
    shift_fold = jnp.tile(p["up_b"] @ wg_s + shift_g, 4)       # (4*Ci,)
    g1_low = matmul_bias(x1.reshape(-1, cin), w_fold, shift_fold,
                         out_dtype=MXU_DTYPE)                  # (N*H1*W1, 4*Ci)
    # pixel-shuffle scatter; channels stay on the last (lane) axis.
    g1 = g1_low.reshape(n, h1, w1, 2, 2, ci)
    g1 = jnp.transpose(g1, (0, 1, 3, 2, 4, 5)).reshape(n, h2, w2, ci)

    # --- attention gate -> psi (1 channel); x1a = x2*psi is never stored ----
    sx, shift_x = _fold_bn(p["wx_b"], p["bn_x"])
    sp, shift_p = _fold_bn(p["wpsi_b"], p["bn_psi"])
    psi = attention_psi(g1.reshape(-1, ci), x2.reshape(-1, ch),
                        p["wx"] * sx[None, :], shift_x,
                        p["wpsi"][:, 0] * sp[0], shift_p)
    psi = psi.reshape(n, h2, w2, 1)

    # --- DoubleConv; concat([x2, x2*psi], C) is fused into the first conv ---
    s1, shift1 = _fold_bn(p["c1_b"], p["bn_c1"])
    wk1_a = _stack_conv_weight(p["c1_w"][:, :ch], s1)   # x2 half of the concat
    wk1_b = _stack_conv_weight(p["c1_w"][:, ch:], s1)   # x2*psi half
    y = conv3x3_concat_gate_bn_relu(x2, psi, wk1_a, wk1_b, shift1)

    s2, shift2 = _fold_bn(p["c2_b"], p["bn_c2"])
    wk2 = _stack_conv_weight(p["c2_w"], s2)
    y = conv3x3_bn_relu(y, wk2, shift2)

    # back to NCHW
    return jnp.transpose(y, (0, 3, 1, 2))


if __name__ == "__main__":
    # TODO(synk): BatchNorm is implemented in eval mode (running statistics),
    # matching inference semantics; PyTorch's default train-mode batch stats
    # would require a cross-pixel reduction pass not modeled here.
    key = jax.random.PRNGKey(0)
    in_channels, out_channels = 8, 8
    B, H2, W2 = 2, 16, 16                     # x2 spatial (skip connection)
    H1, W1 = H2 // 2, W2 // 2                 # x1 spatial (to be upsampled)

    k1, k2, k3 = jax.random.split(key, 3)
    x1 = jax.random.normal(k1, (B, in_channels, H1, W1), F32)        # NCHW
    x2 = jax.random.normal(k2, (B, in_channels // 2, H2, W2), F32)   # NCHW
    params = init_up_params(k3, in_channels, out_channels)

    out = up_forward(x1, x2, params)
    out = jax.block_until_ready(out)
    assert out.shape == (B, out_channels, H2, W2), out.shape
    assert jnp.all(jnp.isfinite(out))
    print("KERNEL_OK")
</pallas_src>

<mosaic_0001>
module attributes {stable_mosaic.version = 11 : i64} {
  func.func @_mm_bias_kernel(%arg0: i32, %arg1: memref<128x8xbf16, #tpu.memory_space<vmem>>, %arg2: memref<8x8xbf16, #tpu.memory_space<vmem>>, %arg3: memref<1x8xf32, #tpu.memory_space<vmem>>, %arg4: memref<128x8xbf16, #tpu.memory_space<vmem>>) attributes {dimension_semantics = [#tpu.dimension_semantics<parallel>], iteration_bounds = array<i64: 1>, scalar_prefetch = 0 : i64, scratch_operands = 0 : i64, tpu.core_type = #tpu.core_type<tc>, window_params = [{transform_indices = @transform_0, window_bounds = array<i64: 128, 8>}, {pipeline_mode = #tpu.pipeline_mode<synchronous>, transform_indices = @transform_1, window_bounds = array<i64: 8, 8>}, {pipeline_mode = #tpu.pipeline_mode<synchronous>, transform_indices = @transform_2, window_bounds = array<i64: 1, 8>}, {transform_indices = @transform_3, window_bounds = array<i64: 128, 8>}]} {
    %c0 = arith.constant 0 : index
    %c0_0 = arith.constant 0 : index
    %0 = vector.load %arg1[%c0, %c0_0] : memref<128x8xbf16, #tpu.memory_space<vmem>>, vector<128x8xbf16>
    %c0_1 = arith.constant 0 : index
    %c0_2 = arith.constant 0 : index
    %1 = vector.load %arg2[%c0_1, %c0_2] : memref<8x8xbf16, #tpu.memory_space<vmem>>, vector<8x8xbf16>
    %cst = arith.constant dense<0.000000e+00> : vector<128x8xf32>
    %2 = tpu.matmul %0, %1, %cst {dimension_numbers = #tpu.dot_dimension_numbers<[1], [0], [0], [1], [0, 0, 1, 1], [], []>} : vector<128x8xbf16>, vector<8x8xbf16>, vector<128x8xf32> -> vector<128x8xf32>
    %c0_3 = arith.constant 0 : index
    %c0_4 = arith.constant 0 : index
    %3 = vector.load %arg3[%c0_3, %c0_4] : memref<1x8xf32, #tpu.memory_space<vmem>>, vector<1x8xf32>
    %4 = vector.broadcast %3 : vector<1x8xf32> to vector<128x8xf32>
    %5 = arith.addf %2, %4 : vector<128x8xf32>
    %6 = arith.truncf %5 : vector<128x8xf32> to vector<128x8xbf16>
    %c0_5 = arith.constant 0 : index
    %c0_6 = arith.constant 0 : index
    %7 = vector.load %arg4[%c0_5, %c0_6] : memref<128x8xbf16, #tpu.memory_space<vmem>>, vector<128x8xbf16>
    tpu.vector_store %arg4[%c0_5, %c0_6], %6 {strides = array<i32>} : memref<128x8xbf16, #tpu.memory_space<vmem>>, vector<128x8xbf16>,
    return
  }
  func.func @transform_0(%arg0: i32) -> (i32, i32) {
    %c0_i32 = arith.constant 0 : i32
    %c0_i32_0 = arith.constant 0 : i32
    return %arg0, %c0_i32 : i32, i32
  }
  func.func @transform_1(%arg0: i32) -> (i32, i32) {
    %c0_i32 = arith.constant 0 : i32
    %c0_i32_0 = arith.constant 0 : i32
    %c0_i32_1 = arith.constant 0 : i32
    return %c0_i32, %c0_i32_0 : i32, i32
  }
  func.func @transform_2(%arg0: i32) -> (i32, i32) {
    %c0_i32 = arith.constant 0 : i32
    %c0_i32_0 = arith.constant 0 : i32
    %c0_i32_1 = arith.constant 0 : i32
    return %c0_i32, %c0_i32_0 : i32, i32
  }
  func.func @transform_3(%arg0: i32) -> (i32, i32) {
    %c0_i32 = arith.constant 0 : i32
    %c0_i32_0 = arith.constant 0 : i32
    return %arg0, %c0_i32 : i32, i32
  }
}

</mosaic_0001>

<bundles_post_ra>
// kernel: tpu_custom_call.1
= control target key start
LH: loop header
LB: loop body
LE: loop exit
PB: predicated region body
PF: predicated region fallthrough
CT: control target
= control target key end

     0   :  { %vm104_vm0 = vcmask 1043456   ;;  %vm79_vm1 = vcmask 64512   ;;  %vm269_vm2 = vcmask 60416   ;;  %s500_s1 = inlined_call_operand.vmem [shape: bf16[8,8], index: 1, kind: input, shape index: {}]   ;;  %s501_s0 = inlined_call_operand.vmem [shape: bf16[128,8], index: 0, kind: input, shape index: {}]   ;;  %s502_s2 = inlined_call_operand.vmem [shape: f32[1,8], index: 2, kind: input, shape index: {}]   ;;  %s503_s3 = inlined_call_operand.vmem [shape: bf16[128,8], index: 3, kind: output, shape index: {}]  }
   0x1   :  { %v31_v0 = vld [vmem:[%s500_s1] sm:$0xf]  ;;  %v372_v4 = vld [vmem:[%s501_s0 + $0x8] sm:$0xff]   ;;  %v374_v6 = vld [vmem:[%s501_s0 + $0x10] sm:$0xff]  }
   0x2   :  { %368 = vmatprep.subr.msk.bf16.mxu0 %vm104_vm0, %v31_v0  ;;  %369 = vmatprep.subr.msk.bf16.mxu1 %vm104_vm0, %v31_v0  ;;  %v106_v1 = vsel %vm104_vm0, %v31_v0, 0  ;;  %v370_v2 = vld [vmem:[%s501_s0] sm:$0xff]   ;;  %v373_v5 = vld [vmem:[%s501_s0 + $0x28] sm:$0xff]   ;;  %v375_v7 = vld [vmem:[%s501_s0 + $0x30] sm:$0xff]  }
   0x3   :  { %349 = vmatpush3.bf16.msra.mxu0 %v106_v1  ;;  %367 = vmatpush3.bf16.msra.mxu1 %v106_v1  ;;  %v371_v3 = vld [vmem:[%s501_s0 + $0x20] sm:$0xff]   ;;  %v376_v8 = vld [vmem:[%s501_s0 + $0x18] sm:$0xff]  }
   0x4   :  { %350 = vmatprep.mubr.msk.bf16.mxu0 %vm79_vm1, %v370_v2  ;;  %358 = vmatprep.mubr.msk.bf16.mxu1 %vm79_vm1, %v371_v3  ;;  %v377_v9 = vld [vmem:[%s501_s0 + $0x38] sm:$0xff]   ;;  %v290_v10 = vld [vmem:[%s502_s2] ss:$0 sm:$0xff] }
   0x6   :  { %351 = vmatmul.mubr.msk.bf16.vlgmr.msra.gmra.mxu0 %vm79_vm1, %v372_v4  ;;  %359 = vmatmul.mubr.msk.bf16.vlgmr.msra.gmra.mxu1 %vm79_vm1, %v373_v5 }
   0x7   :  { %354 = vmatprep.mubr.msk.bf16.mxu0 %vm79_vm1, %v374_v6  ;;  %362 = vmatprep.mubr.msk.bf16.mxu1 %vm79_vm1, %v375_v7 }
   0xe   :  { %355 = vmatmul.mubr.msk.bf16.gmra.mxu0 %vm79_vm1, %v376_v8  ;;  %363 = vmatmul.mubr.msk.bf16.gmra.mxu1 %vm79_vm1, %v377_v9 }
  0xc6   :  { %v352_v11 = vpop.f32.mrf.mxu0  ;;  %v360_v13 = vpop.f32.mrf.mxu1 }
  0xc7   :  { %v151_v12 = vadd.f32 %v352_v11, %v290_v10  ;;  %v183_v14 = vadd.f32 %v360_v13, %v290_v10 }
  0xc8   :  { %v142_v15 = vpop.f32.mrf.mxu0  ;;  %v174_v18 = vpop.f32.mrf.mxu1 }
  0xc9   :  { %v325_v16 = vpack.c.bf16 %v151_v12, %v151_v12  ;;  %v143_v17 = vadd.f32 %v290_v10, %v142_v15  ;;  %v333_v19 = vpack.c.bf16 %v183_v14, %v183_v14  ;;  %v175_v20 = vadd.f32 %v290_v10, %v174_v18 }
  0xca   :  { %v353_v21 = vpop.f32.mrf.mxu0  ;;  %v361_v24 = vpop.f32.mrf.mxu1 }
  0xcb   :  { %272 = vst.msk [vmem:[%s503_s3 + $0x8] sm:$0xf] %vm269_vm2, %v325_v16  ;;  %v323_v22 = vpack.c.bf16 %v143_v17, %v143_v17  ;;  %v154_v23 = vadd.f32 %v353_v21, %v290_v10  ;;  %280 = vst.msk [vmem:[%s503_s3 + $0x28] sm:$0xf] %vm269_vm2, %v333_v19  ;;  %v331_v25 = vpack.c.bf16 %v175_v20, %v175_v20 }
  0xcc   :  { %v186_v26 = vadd.f32 %v361_v24, %v290_v10  ;;  %v145_v27 = vpop.f32.mrf.mxu0  ;;  %v177_v30 = vpop.f32.mrf.mxu1 }
  0xcd   :  { %270 = vst.msk [vmem:[%s503_s3] sm:$0xf] %vm269_vm2, %v323_v22  ;;  %v326_v28 = vpack.c.bf16 %v154_v23, %v154_v23  ;;  %v146_v29 = vadd.f32 %v290_v10, %v145_v27  ;;  %278 = vst.msk [vmem:[%s503_s3 + $0x20] sm:$0xf] %vm269_vm2, %v331_v25  ;;  %v178_v32 = vadd.f32 %v290_v10, %v177_v30 }
  0xce   :  { %v334_v31 = vpack.c.bf16 %v186_v26, %v186_v26  ;;  %v356_v33 = vpop.f32.mrf.mxu0  ;;  %v364_v36 = vpop.f32.mrf.mxu1 }
  0xcf   :  { %273 = vst.msk [vmem:[%s503_s3 + $0xc] sm:$0xf] %vm269_vm2, %v326_v28  ;;  %v324_v34 = vpack.c.bf16 %v146_v29, %v146_v29  ;;  %v167_v35 = vadd.f32 %v356_v33, %v290_v10  ;;  %v332_v37 = vpack.c.bf16 %v178_v32, %v178_v32  ;;  %v199_v38 = vadd.f32 %v364_v36, %v290_v10 }
  0xd0   :  { %281 = vst.msk [vmem:[%s503_s3 + $0x2c] sm:$0xf] %vm269_vm2, %v334_v31  ;;  %v158_v39 = vpop.f32.mrf.mxu0  ;;  %v190_v42 = vpop.f32.mrf.mxu1 }
  0xd1   :  { %271 = vst.msk [vmem:[%s503_s3 + $0x4] sm:$0xf] %vm269_vm2, %v324_v34  ;;  %v329_v40 = vpack.c.bf16 %v167_v35, %v167_v35  ;;  %v159_v41 = vadd.f32 %v290_v10, %v158_v39  ;;  %279 = vst.msk [vmem:[%s503_s3 + $0x24] sm:$0xf] %vm269_vm2, %v332_v37  ;;  %v337_v43 = vpack.c.bf16 %v199_v38, %v199_v38 }
  0xd2   :  { %v191_v44 = vadd.f32 %v290_v10, %v190_v42  ;;  %v357_v45 = vpop.f32.mrf.mxu0  ;;  %v365_v48 = vpop.f32.mrf.mxu1 }
  0xd3   :  { %276 = vst.msk [vmem:[%s503_s3 + $0x18] sm:$0xf] %vm269_vm2, %v329_v40  ;;  %v327_v46 = vpack.c.bf16 %v159_v41, %v159_v41  ;;  %v170_v47 = vadd.f32 %v357_v45, %v290_v10  ;;  %284 = vst.msk [vmem:[%s503_s3 + $0x38] sm:$0xf] %vm269_vm2, %v337_v43  ;;  %v202_v50 = vadd.f32 %v365_v48, %v290_v10 }
  0xd4   :  { %v335_v49 = vpack.c.bf16 %v191_v44, %v191_v44  ;;  %v161_v51 = vpop.f32.mrf.mxu0  ;;  %v193_v54 = vpop.f32.mrf.mxu1 }
  0xd5   :  { %274 = vst.msk [vmem:[%s503_s3 + $0x10] sm:$0xf] %vm269_vm2, %v327_v46  ;;  %v330_v52 = vpack.c.bf16 %v170_v47, %v170_v47  ;;  %v162_v53 = vadd.f32 %v290_v10, %v161_v51  ;;  %v338_v55 = vpack.c.bf16 %v202_v50, %v202_v50  ;;  %v194_v56 = vadd.f32 %v290_v10, %v193_v54 }
  0xd6   :  { %282 = vst.msk [vmem:[%s503_s3 + $0x30] sm:$0xf] %vm269_vm2, %v335_v49 }
  0xd7   :  { %277 = vst.msk [vmem:[%s503_s3 + $0x1c] sm:$0xf] %vm269_vm2, %v330_v52  ;;  %v328_v57 = vpack.c.bf16 %v162_v53, %v162_v53  ;;  %285 = vst.msk [vmem:[%s503_s3 + $0x3c] sm:$0xf] %vm269_vm2, %v338_v55  ;;  %v336_v58 = vpack.c.bf16 %v194_v56, %v194_v56 }
  0xd9   :  { %275 = vst.msk [vmem:[%s503_s3 + $0x14] sm:$0xf] %vm269_vm2, %v328_v57  ;;  %283 = vst.msk [vmem:[%s503_s3 + $0x34] sm:$0xf] %vm269_vm2, %v336_v58 }

</bundles_post_ra>
